<compile_context>
chip_gen: v7x
topology: tpu7x:2x2x1
jax: 0.10.0
libtpu: 0.0.40
codegen_flags: <defaults>
</compile_context>

<pallas_src>
import jax
import jax.numpy as jnp
from jax.experimental import pallas as pl
from jax.experimental.pallas import tpu as pltpu

HIDDEN = 5
IN_FEATURES = 24 * 24  # 576

# Batch tile: large enough to amortize the ~0.35 us/step grid overhead, small
# enough that the double-buffered x tile (2 * TB * 576 * 4 B ~= 9.4 MiB at
# TB=2048) fits the scoped-VMEM default on every generation
# (v5e 16 MiB, v6e 32 MiB, v7x 32 MiB scoped / 64 MiB physical).
MAX_TB = 2048


def _fcn_kernel(x_ref, w1_ref, b1_ref, w2_ref, b2_ref, o_ref):
    # Layer 1 on the MXU: (TB, 576) @ (576, H) -> (TB, H), f32 accumulate.
    h = jnp.dot(x_ref[...], w1_ref[...], preferred_element_type=jnp.float32)
    h = jax.nn.sigmoid(h + b1_ref[...])                    # (1, H) bias broadcast
    # Layer 2 (K=H=5, N=1): keep it off the MXU — one VPU multiply plus a tiny
    # lane reduce instead of a serialized 5x1 matmul pass per grid step.
    o = jnp.sum(h * w2_ref[...], axis=-1, keepdims=True) + b2_ref[...]
    o_ref[...] = jax.nn.sigmoid(o)


def _round_up(n, m):
    return ((n + m - 1) // m) * m


def fully_connected_network(x, w1, b1, w2, b2):
    """Forward pass of FullyConnectedNetwork.

    x  : (B, 24, 24) float32 (or bfloat16 — accepted without an extra cast pass)
    w1 : (576, hidden)  pre-transposed torch.nn.Linear weight
    b1 : (hidden,)
    w2 : (hidden, 1)
    b2 : (1,)
    returns (B, 1) float32
    """
    B = x.shape[0]
    x_flat = x.reshape(B, IN_FEATURES)
    if x_flat.dtype not in (jnp.float32, jnp.bfloat16):
        x_flat = x_flat.astype(jnp.float32)

    hidden = w1.shape[1]
    w1 = w1.astype(jnp.float32)
    b1_2d = b1.reshape(1, hidden).astype(jnp.float32)
    w2_row = w2.reshape(1, hidden).astype(jnp.float32)  # (H,1) -> (1,H) row for the VPU reduce
    b2_2d = b2.reshape(1, 1).astype(jnp.float32)

    # Batch tiling: tile must be a multiple of 8 (sublane). Pad ragged batches
    # with zero rows; padded rows are sliced off the output afterwards.
    tb = min(MAX_TB, _round_up(B, 8))
    b_pad = _round_up(B, tb)
    if b_pad != B:
        x_flat = jnp.pad(x_flat, ((0, b_pad - B), (0, 0)))

    grid = (b_pad // tb,)

    out = pl.pallas_call(
        _fcn_kernel,
        out_shape=jax.ShapeDtypeStruct((b_pad, 1), jnp.float32),
        grid_spec=pltpu.PrefetchScalarGridSpec(
            num_scalar_prefetch=0,
            grid=grid,
            in_specs=[
                # x streams tile-by-tile over the batch grid (double-buffered).
                # 576 is not a multiple of 128, so keep full extent on that dim.
                pl.BlockSpec((tb, IN_FEATURES), lambda i: (i, 0)),
                # Weights / biases: constant index_map -> DMA'd once, resident
                # in VMEM across all grid steps (total < 20 KB).
                pl.BlockSpec((IN_FEATURES, hidden), lambda i: (0, 0)),
                pl.BlockSpec((1, hidden), lambda i: (0, 0)),
                pl.BlockSpec((1, hidden), lambda i: (0, 0)),
                pl.BlockSpec((1, 1), lambda i: (0, 0)),
            ],
            out_specs=pl.BlockSpec((tb, 1), lambda i: (i, 0)),
        ),
        compiler_params=pltpu.CompilerParams(
            # Batch tiles are independent -> lets Mosaic shard the grid across
            # both TensorCores on v7x; harmless no-op on v5e/v6e.
            dimension_semantics=("parallel",),
        ),
    )(x_flat, w1, b1_2d, w2_row, b2_2d)

    return out[:B]


def init_params(key, hidden=HIDDEN):
    """Deterministic init mirroring torch.nn.Linear's U(-1/sqrt(fan_in), 1/sqrt(fan_in))."""
    k1, k2, k3, k4 = jax.random.split(key, 4)
    bound1 = 1.0 / jnp.sqrt(IN_FEATURES)
    bound2 = 1.0 / jnp.sqrt(hidden)
    w1 = jax.random.uniform(k1, (IN_FEATURES, hidden), jnp.float32, -bound1, bound1)
    b1 = jax.random.uniform(k2, (hidden,), jnp.float32, -bound1, bound1)
    w2 = jax.random.uniform(k3, (hidden, 1), jnp.float32, -bound2, bound2)
    b2 = jax.random.uniform(k4, (1,), jnp.float32, -bound2, bound2)
    return w1, b1, w2, b2


if __name__ == "__main__":
    key = jax.random.PRNGKey(0)
    k_x, k_p = jax.random.split(key)

    # B=10 deliberately not a multiple of the 8-row sublane tile, to exercise
    # the ragged-batch padding path.
    B = 10
    x = jax.random.normal(k_x, (B, 24, 24), dtype=jnp.float32)
    w1, b1, w2, b2 = init_params(k_p, hidden=HIDDEN)

    out = fully_connected_network(x, w1, b1, w2, b2)
    out = jax.block_until_ready(out)

    # Reference check in plain JAX (same math as the PyTorch module).
    ref = jax.nn.sigmoid(
        jax.nn.sigmoid(x.reshape(B, -1) @ w1 + b1) @ w2 + b2
    )
    assert out.shape == (B, 1)
    assert jnp.allclose(out, ref, atol=1e-5, rtol=1e-5)

    print("KERNEL_OK")
</pallas_src>

<mosaic_0001>
module attributes {stable_mosaic.version = 11 : i64} {
  func.func @_fcn_kernel(%arg0: i32, %arg1: memref<16x576xf32, #tpu.memory_space<vmem>>, %arg2: memref<576x5xf32, #tpu.memory_space<vmem>>, %arg3: memref<1x5xf32, #tpu.memory_space<vmem>>, %arg4: memref<1x5xf32, #tpu.memory_space<vmem>>, %arg5: memref<1x1xf32, #tpu.memory_space<vmem>>, %arg6: memref<16x1xf32, #tpu.memory_space<vmem>>) attributes {dimension_semantics = [#tpu.dimension_semantics<parallel>], iteration_bounds = array<i64: 1>, scalar_prefetch = 0 : i64, scratch_operands = 0 : i64, tpu.core_type = #tpu.core_type<tc>, window_params = [{transform_indices = @transform_0, window_bounds = array<i64: 16, 576>}, {pipeline_mode = #tpu.pipeline_mode<synchronous>, transform_indices = @transform_1, window_bounds = array<i64: 576, 5>}, {pipeline_mode = #tpu.pipeline_mode<synchronous>, transform_indices = @transform_2, window_bounds = array<i64: 1, 5>}, {pipeline_mode = #tpu.pipeline_mode<synchronous>, transform_indices = @transform_3, window_bounds = array<i64: 1, 5>}, {pipeline_mode = #tpu.pipeline_mode<synchronous>, transform_indices = @transform_4, window_bounds = array<i64: 1, 1>}, {transform_indices = @transform_5, window_bounds = array<i64: 16, 1>}]} {
    %c0 = arith.constant 0 : index
    %c0_0 = arith.constant 0 : index
    %0 = vector.load %arg1[%c0, %c0_0] : memref<16x576xf32, #tpu.memory_space<vmem>>, vector<16x576xf32>
    %c0_1 = arith.constant 0 : index
    %c0_2 = arith.constant 0 : index
    %1 = vector.load %arg2[%c0_1, %c0_2] : memref<576x5xf32, #tpu.memory_space<vmem>>, vector<576x5xf32>
    %cst = arith.constant dense<0.000000e+00> : vector<16x5xf32>
    %2 = tpu.matmul %0, %1, %cst {dimension_numbers = #tpu.dot_dimension_numbers<[1], [0], [0], [1], [0, 0, 1, 1], [], []>} : vector<16x576xf32>, vector<576x5xf32>, vector<16x5xf32> -> vector<16x5xf32>
    %c0_3 = arith.constant 0 : index
    %c0_4 = arith.constant 0 : index
    %3 = vector.load %arg3[%c0_3, %c0_4] : memref<1x5xf32, #tpu.memory_space<vmem>>, vector<1x5xf32>
    %4 = vector.broadcast %3 : vector<1x5xf32> to vector<16x5xf32>
    %5 = arith.addf %2, %4 : vector<16x5xf32>
    %6 = arith.negf %5 : vector<16x5xf32>
    %7 = math.exp %6 : vector<16x5xf32>
    %cst_5 = arith.constant 1.000000e+00 : f32
    %8 = vector.broadcast %cst_5 : f32 to vector<16x5xf32>
    %9 = arith.addf %8, %7 : vector<16x5xf32>
    %10 = arith.divf %8, %9 : vector<16x5xf32>
    %c0_6 = arith.constant 0 : index
    %c0_7 = arith.constant 0 : index
    %11 = vector.load %arg4[%c0_6, %c0_7] : memref<1x5xf32, #tpu.memory_space<vmem>>, vector<1x5xf32>
    %12 = vector.broadcast %11 : vector<1x5xf32> to vector<16x5xf32>
    %13 = arith.mulf %10, %12 : vector<16x5xf32>
    %cst_8 = arith.constant dense<0.000000e+00> : vector<16xf32>
    %14 = vector.multi_reduction <add>, %13, %cst_8 [1] : vector<16x5xf32> to vector<16xf32>
    %15 = vector.shape_cast %14 : vector<16xf32> to vector<16x1xf32>
    %c0_9 = arith.constant 0 : index
    %c0_10 = arith.constant 0 : index
    %16 = vector.load %arg5[%c0_9, %c0_10] : memref<1x1xf32, #tpu.memory_space<vmem>>, vector<1x1xf32>
    %17 = vector.broadcast %16 : vector<1x1xf32> to vector<16x1xf32>
    %18 = arith.addf %15, %17 : vector<16x1xf32>
    %19 = arith.negf %18 : vector<16x1xf32>
    %20 = math.exp %19 : vector<16x1xf32>
    %cst_11 = arith.constant 1.000000e+00 : f32
    %21 = vector.broadcast %cst_11 : f32 to vector<16x1xf32>
    %22 = arith.addf %21, %20 : vector<16x1xf32>
    %23 = arith.divf %21, %22 : vector<16x1xf32>
    %c0_12 = arith.constant 0 : index
    %c0_13 = arith.constant 0 : index
    %24 = vector.load %arg6[%c0_12, %c0_13] : memref<16x1xf32, #tpu.memory_space<vmem>>, vector<16x1xf32>
    tpu.vector_store %arg6[%c0_12, %c0_13], %23 {strides = array<i32>} : memref<16x1xf32, #tpu.memory_space<vmem>>, vector<16x1xf32>,
    return
  }
  func.func @transform_0(%arg0: i32) -> (i32, i32) {
    %c0_i32 = arith.constant 0 : i32
    %c0_i32_0 = arith.constant 0 : i32
    return %arg0, %c0_i32 : i32, i32
  }
  func.func @transform_1(%arg0: i32) -> (i32, i32) {
    %c0_i32 = arith.constant 0 : i32
    %c0_i32_0 = arith.constant 0 : i32
    %c0_i32_1 = arith.constant 0 : i32
    return %c0_i32, %c0_i32_0 : i32, i32
  }
  func.func @transform_2(%arg0: i32) -> (i32, i32) {
    %c0_i32 = arith.constant 0 : i32
    %c0_i32_0 = arith.constant 0 : i32
    %c0_i32_1 = arith.constant 0 : i32
    return %c0_i32, %c0_i32_0 : i32, i32
  }
  func.func @transform_3(%arg0: i32) -> (i32, i32) {
    %c0_i32 = arith.constant 0 : i32
    %c0_i32_0 = arith.constant 0 : i32
    %c0_i32_1 = arith.constant 0 : i32
    return %c0_i32, %c0_i32_0 : i32, i32
  }
  func.func @transform_4(%arg0: i32) -> (i32, i32) {
    %c0_i32 = arith.constant 0 : i32
    %c0_i32_0 = arith.constant 0 : i32
    %c0_i32_1 = arith.constant 0 : i32
    return %c0_i32, %c0_i32_0 : i32, i32
  }
  func.func @transform_5(%arg0: i32) -> (i32, i32) {
    %c0_i32 = arith.constant 0 : i32
    %c0_i32_0 = arith.constant 0 : i32
    return %arg0, %c0_i32 : i32, i32
  }
}

</mosaic_0001>

<bundles_post_ra>
// kernel: tpu_custom_call.1
= control target key start
LH: loop header
LB: loop body
LE: loop exit
PB: predicated region body
PF: predicated region fallthrough
CT: control target
= control target key end

     0   :  { %vm111_vm0 = vcmask 523264   ;;  %vm364_vm1 = vcmask 39936   ;;  %vm392_vm2 = vcmask 7168   ;;  %s900_s1 = inlined_call_operand.vmem [shape: f32[576,5], index: 1, kind: input, shape index: {}]   ;;  %s901_s0 = inlined_call_operand.vmem [shape: f32[16,576], index: 0, kind: input, shape index: {}]   ;;  %s902_s4 = inlined_call_operand.<no memory space> [shape: f32[1,1], index: 4, kind: input, shape index: {}]   ;;  %s903_s2 = inlined_call_operand.vmem [shape: f32[1,5], index: 2, kind: input, shape index: {}]   ;;  %s904_s3 = inlined_call_operand.vmem [shape: f32[1,5], index: 3, kind: input, shape index: {}]   ;;  %s905_s5 = inlined_call_operand.vmem [shape: f32[16,1], index: 5, kind: output, shape index: {}]  }
   0x1   :  { %v48_v0 = vld [vmem:[%s900_s1 + $0x80] sm:$0xff]  ;;  %v49_v1 = vld [vmem:[%s900_s1 + $0x88] sm:$0xff]  ;;  %v50_v11 = vld [vmem:[%s900_s1 + $0x90] sm:$0xff] }
   0x2   :  { %v32_v2 = vld [vmem:[%s900_s1] sm:$0xff]  ;;  %v513_v3 = vpack.c.bf16 %v49_v1, %v48_v0  ;;  %v33_v4 = vld [vmem:[%s900_s1 + $0x8] sm:$0xff]  ;;  %v51_v13 = vld [vmem:[%s900_s1 + $0x98] sm:$0xff] }
   0x3   :  { %v80_v5 = vld [vmem:[%s900_s1 + $0x180] sm:$0xff]  ;;  %v81_v6 = vld [vmem:[%s900_s1 + $0x188] sm:$0xff]  ;;  %v515_v7 = vpack.c.bf16 %v33_v4, %v32_v2  ;;  %v34_v14 = vld [vmem:[%s900_s1 + $0x10] sm:$0xff]  ;;  %v517_v16 = vpack.c.bf16 %v51_v13, %v50_v11 }
   0x4   :  { %v545_v8 = vpack.c.bf16 %v81_v6, %v80_v5  ;;  %v64_v9 = vld [vmem:[%s900_s1 + $0x100] sm:$0xff]  ;;  %v65_v10 = vld [vmem:[%s900_s1 + $0x108] sm:$0xff]  ;;  %514 = vmatprep.subr.bf16.mxu0 %v513_v3  ;;  %v35_v15 = vld [vmem:[%s900_s1 + $0x18] sm:$0xff] }
   0x5   :  { %v547_v12 = vpack.c.bf16 %v65_v10, %v64_v9  ;;  %516 = vmatpush3.bf16.msra.mxu0 %v515_v7  ;;  %v519_v17 = vpack.c.bf16 %v35_v15, %v34_v14  ;;  %v82_v18 = vld [vmem:[%s900_s1 + $0x190] sm:$0xff]  ;;  %v83_v19 = vld [vmem:[%s900_s1 + $0x198] sm:$0xff]  ;;  %v52_v23 = vld [vmem:[%s900_s1 + $0xa0] sm:$0xff] }
   0x6   :  { %546 = vmatprep.subr.bf16.mxu1 %v545_v8  ;;  %v66_v20 = vld [vmem:[%s900_s1 + $0x110] sm:$0xff]  ;;  %v549_v21 = vpack.c.bf16 %v83_v19, %v82_v18  ;;  %v67_v22 = vld [vmem:[%s900_s1 + $0x118] sm:$0xff]  ;;  %v53_v24 = vld [vmem:[%s900_s1 + $0xa8] sm:$0xff]  ;;  %518 = vmatprep.subr.bf16.mxu0 %v517_v16 }
   0x7   :  { %548 = vmatpush3.bf16.msra.mxu1 %v547_v12  ;;  %v551_v25 = vpack.c.bf16 %v67_v22, %v66_v20  ;;  %v521_v26 = vpack.c.bf16 %v53_v24, %v52_v23  ;;  %v36_v27 = vld [vmem:[%s900_s1 + $0x20] sm:$0xff]  ;;  %v37_v28 = vld [vmem:[%s900_s1 + $0x28] sm:$0xff]  ;;  %v54_v35 = vld [vmem:[%s900_s1 + $0xb0] sm:$0xff] }
   0x8   :  { %v84_v29 = vld [vmem:[%s900_s1 + $0x1a0] sm:$0xff]  ;;  %550 = vmatprep.subr.bf16.mxu1 %v549_v21  ;;  %v85_v30 = vld [vmem:[%s900_s1 + $0x1a8] sm:$0xff]  ;;  %v523_v33 = vpack.c.bf16 %v37_v28, %v36_v27  ;;  %v55_v36 = vld [vmem:[%s900_s1 + $0xb8] sm:$0xff] }
   0x9   :  { %v68_v31 = vld [vmem:[%s900_s1 + $0x120] sm:$0xff]  ;;  %v69_v32 = vld [vmem:[%s900_s1 + $0x128] sm:$0xff]  ;;  %520 = vmatpush3.bf16.msra.mxu0 %v519_v17  ;;  %v553_v34 = vpack.c.bf16 %v85_v30, %v84_v29  ;;  %v38_v37 = vld [vmem:[%s900_s1 + $0x30] sm:$0xff]  ;;  %v525_v39 = vpack.c.bf16 %v55_v36, %v54_v35 }
   0xa   :  { %522 = vmatprep.subr.bf16.mxu0 %v521_v26  ;;  %v555_v38 = vpack.c.bf16 %v69_v32, %v68_v31  ;;  %v39_v40 = vld [vmem:[%s900_s1 + $0x38] sm:$0xff]  ;;  %v86_v41 = vld [vmem:[%s900_s1 + $0x1b0] sm:$0xff]  ;;  %v56_v46 = vld [vmem:[%s900_s1 + $0xc0] sm:$0xff] }
   0xb   :  { %552 = vmatpush3.bf16.msra.mxu1 %v551_v25  ;;  %v87_v42 = vld [vmem:[%s900_s1 + $0x1b8] sm:$0xff]  ;;  %v70_v44 = vld [vmem:[%s900_s1 + $0x130] sm:$0xff]  ;;  %v57_v47 = vld [vmem:[%s900_s1 + $0xc8] sm:$0xff]  ;;  %v527_v48 = vpack.c.bf16 %v39_v40, %v38_v37 }
   0xc   :  { %554 = vmatprep.subr.bf16.mxu1 %v553_v34  ;;  %v557_v43 = vpack.c.bf16 %v87_v42, %v86_v41  ;;  %v71_v45 = vld [vmem:[%s900_s1 + $0x138] sm:$0xff]  ;;  %v88_v49 = vld [vmem:[%s900_s1 + $0x1c0] sm:$0xff]  ;;  %v89_v50 = vld [vmem:[%s900_s1 + $0x1c8] sm:$0xff]  ;;  %v529_v52 = vpack.c.bf16 %v57_v47, %v56_v46 }
   0xd   :  { %524 = vmatpush3.bf16.msra.mxu0 %v523_v33  ;;  %v559_v51 = vpack.c.bf16 %v71_v45, %v70_v44  ;;  %v40_v53 = vld [vmem:[%s900_s1 + $0x40] sm:$0xff]  ;;  %v41_v54 = vld [vmem:[%s900_s1 + $0x48] sm:$0xff]  ;;  %v561_v56 = vpack.c.bf16 %v89_v50, %v88_v49  ;;  %v58_v58 = vld [vmem:[%s900_s1 + $0xd0] sm:$0xff] }
   0xe   :  { %526 = vmatprep.subr.bf16.mxu0 %v525_v39  ;;  %v72_v55 = vld [vmem:[%s900_s1 + $0x140] sm:$0xff]  ;;  %v73_v57 = vld [vmem:[%s900_s1 + $0x148] sm:$0xff]  ;;  %v59_v59 = vld [vmem:[%s900_s1 + $0xd8] sm:$0xff]  ;;  %v531_v62 = vpack.c.bf16 %v41_v54, %v40_v53  ;;  %v10_v54 = vstv %s902_s4 }
   0xf   :  { %556 = vmatpush3.bf16.msra.mxu1 %v555_v38  ;;  %v90_v60 = vld [vmem:[%s900_s1 + $0x1d0] sm:$0xff]  ;;  %v91_v61 = vld [vmem:[%s900_s1 + $0x1d8] sm:$0xff]  ;;  %v563_v63 = vpack.c.bf16 %v73_v57, %v72_v55  ;;  %v533_v0 = vpack.c.bf16 %v59_v59, %v58_v58  ;;  %v60_v6 = vld [vmem:[%s900_s1 + $0xe0] sm:$0xff]  ;;  %11 = vst [vmem:[#allocation2] sm:$0x1] %v10_v54 }
  0x10   :  { %558 = vmatprep.subr.bf16.mxu1 %v557_v43  ;;  %v42_v1 = vld [vmem:[%s900_s1 + $0x50] sm:$0xff]  ;;  %v43_v2 = vld [vmem:[%s900_s1 + $0x58] sm:$0xff]  ;;  %v565_v4 = vpack.c.bf16 %v91_v61, %v90_v60  ;;  %v61_v7 = vld [vmem:[%s900_s1 + $0xe8] sm:$0xff] }
  0x11   :  { %528 = vmatpush3.bf16.msra.mxu0 %v527_v48  ;;  %v74_v3 = vld [vmem:[%s900_s1 + $0x150] sm:$0xff]  ;;  %v75_v5 = vld [vmem:[%s900_s1 + $0x158] sm:$0xff]  ;;  %v92_v8 = vld [vmem:[%s900_s1 + $0x1e0] sm:$0xff]  ;;  %v535_v10 = vpack.c.bf16 %v43_v2, %v42_v1  ;;  %v537_v14 = vpack.c.bf16 %v61_v7, %v60_v6 }
  0x12   :  { %530 = vmatprep.subr.bf16.mxu0 %v529_v52  ;;  %v93_v9 = vld [vmem:[%s900_s1 + $0x1e8] sm:$0xff]  ;;  %v44_v11 = vld [vmem:[%s900_s1 + $0x60] sm:$0xff]  ;;  %v567_v13 = vpack.c.bf16 %v75_v5, %v74_v3  ;;  %v62_v19 = vld [vmem:[%s900_s1 + $0xf0] sm:$0xff] }
  0x13   :  { %560 = vmatpush3.bf16.msra.mxu1 %v559_v51  ;;  %v23_v12 = vld [vmem:[%s901_s0 + $0x8] sm:$0xff]  ;;  %v76_v16 = vld [vmem:[%s900_s1 + $0x160] sm:$0xff]  ;;  %v569_v18 = vpack.c.bf16 %v93_v9, %v92_v8  ;;  %v63_v20 = vld [vmem:[%s900_s1 + $0xf8] sm:$0xff] }
  0x14   :  { %562 = vmatprep.subr.bf16.mxu1 %v561_v56  ;;  %v45_v15 = vld [vmem:[%s900_s1 + $0x68] sm:$0xff]  ;;  %182 = vmatprep.mubr.f32.mxu0 %v23_v12  ;;  %v25_v21 = vld [vmem:[%s901_s0 + $0x18] sm:$0xff]  ;;  %v94_v22 = vld [vmem:[%s900_s1 + $0x1f0] sm:$0xff]  ;;  %v541_v26 = vpack.c.bf16 %v63_v20, %v62_v19 }
  0x15   :  { %532 = vmatpush3.bf16.msra.mxu0 %v531_v62  ;;  %v77_v17 = vld [vmem:[%s900_s1 + $0x168] sm:$0xff]  ;;  %v95_v23 = vld [vmem:[%s900_s1 + $0x1f8] sm:$0xff]  ;;  %257 = vmatprep.mubr.f32.mxu1 %v25_v21  ;;  %v539_v24 = vpack.c.bf16 %v45_v15, %v44_v11  ;;  %v46_v27 = vld [vmem:[%s900_s1 + $0x70] sm:$0xff] }
  0x16   :  { %534 = vmatprep.subr.bf16.mxu0 %v533_v0  ;;  %v571_v25 = vpack.c.bf16 %v77_v17, %v76_v16  ;;  %v47_v28 = vld [vmem:[%s900_s1 + $0x78] sm:$0xff]  ;;  %v78_v29 = vld [vmem:[%s900_s1 + $0x170] sm:$0xff]  ;;  %v573_v30 = vpack.c.bf16 %v95_v23, %v94_v22  ;;  %v96_v32 = vld [vmem:[%s900_s1 + $0x200] sm:$0xff] }
  0x17   :  { %564 = vmatpush3.bf16.msra.mxu1 %v563_v63  ;;  %v79_v31 = vld [vmem:[%s900_s1 + $0x178] sm:$0xff]  ;;  %v97_v33 = vld [vmem:[%s900_s1 + $0x208] sm:$0xff]  ;;  %v543_v34 = vpack.c.bf16 %v47_v28, %v46_v27  ;;  %v98_v37 = vld [vmem:[%s900_s1 + $0x210] sm:$0xff] }
  0x18   :  { %566 = vmatprep.subr.bf16.mxu1 %v565_v4  ;;  %v575_v35 = vpack.c.bf16 %v79_v31, %v78_v29  ;;  %v577_v36 = vpack.c.bf16 %v97_v33, %v96_v32  ;;  %v99_v38 = vld [vmem:[%s900_s1 + $0x218] sm:$0xff]  ;;  %v22_v39 = vld [vmem:[%s901_s0] sm:$0xff]  ;;  %v24_v40 = vld [vmem:[%s901_s0 + $0x10] sm:$0xff] }
  0x19   :  { %536 = vmatpush3.bf16.msra.mxu0 %v535_v10  ;;  %v581_v41 = vpack.c.bf16 %v99_v38, %v98_v37  ;;  %v28_v42 = vld [vmem:[%s901_s0 + $0x30] sm:$0xff]  ;;  %v100_v43 = vld [vmem:[%s900_s1 + $0x220] sm:$0xff]  ;;  %v101_v44 = vld [vmem:[%s900_s1 + $0x228] sm:$0xff] }
  0x1a   :  { %538 = vmatprep.subr.bf16.mxu0 %v537_v14  ;;  %v30_v45 = vld [vmem:[%s901_s0 + $0x40] sm:$0xff]  ;;  %v27_v46 = vld [vmem:[%s901_s0 + $0x28] sm:$0xff]  ;;  %v585_v47 = vpack.c.bf16 %v101_v44, %v100_v43  ;;  %v29_v48 = vld [vmem:[%s901_s0 + $0x38] sm:$0xff] }
  0x1b   :  { %568 = vmatpush3.bf16.msra.mxu1 %v567_v13  ;;  %v102_v49 = vld [vmem:[%s900_s1 + $0x230] sm:$0xff]  ;;  %v103_v50 = vld [vmem:[%s900_s1 + $0x238] sm:$0xff]  ;;  %v26_v51 = vld [vmem:[%s901_s0 + $0x20] sm:$0xff] }
  0x1c   :  { %570 = vmatprep.subr.bf16.mxu1 %v569_v18  ;;  %v589_v52 = vpack.c.bf16 %v103_v50, %v102_v49  ;;  %v31_v53 = vld [vmem:[%s901_s0 + $0x48] sm:$0xff]  ;;  %v399_v56 = vld [vmem:[%s903_s2] ss:$0 sm:$0xff] }
  0x1d   :  { %540 = vmatpush3.bf16.msra.mxu0 %v539_v24  ;;  %v404_v18 = vld [vmem:[%s904_s3] ss:$0 sm:$0xff] }
  0x1e   :  { %542 = vmatprep.subr.bf16.mxu0 %v541_v26 }
  0x1f   :  { %572 = vmatpush3.bf16.msra.mxu1 %v571_v25  ;;  %v405_v25 = vld [vmem:[#allocation2] ss:$0 sm:$0xff] }
  0x20   :  { %574 = vmatprep.subr.bf16.mxu1 %v573_v30 }
  0x21   :  { %544 = vmatpush3.bf16.msra.mxu0 %v543_v34 }
  0x22   :  { %578 = vmatprep.subr.bf16.mxu0 %v577_v36 }
  0x23   :  { %576 = vmatpush3.bf16.msra.mxu1 %v575_v35 }
  0x24   :  { %183 = vmatmul.mubr.f32.vlgmr.msra.gmra.mrb[0].mxu0 %v22_v39 }
  0x25   :  { %580 = vmatpush3.bf16.msra.mxu0 %v577_v36  ;;  %187 = vmatprep.mubr.f32.mxu0 %v28_v42 }
  0x26   :  { %258 = vmatmul.mubr.f32.vlgmr.msra.gmra.mrb[0].mxu1 %v24_v40  ;;  %582 = vmatprep.subr.bf16.mxu0 %v581_v41 }
  0x27   :  { %262 = vmatprep.mubr.f32.mxu1 %v30_v45 }
  0x28   :  { %188 = vmatmul.mubr.f32.gmra.mrb[2].mxu0 %v27_v46 }
  0x29   :  { %584 = vmatpush3.bf16.msra.mxu0 %v581_v41  ;;  %510 = vmatprep.mubr.msk.f32.mxu0 %vm111_vm0, %v26_v51 }
  0x2a   :  { %263 = vmatmul.mubr.f32.gmra.mrb[2].mxu1 %v29_v48  ;;  %586 = vmatprep.subr.bf16.mxu0 %v585_v47 }
  0x2d   :  { %588 = vmatpush3.bf16.msra.mxu0 %v585_v47 }
  0x2e   :  { %590 = vmatprep.subr.bf16.mxu0 %v589_v52 }
  0x31   :  { %592 = vmatpush3.bf16.msra.mxu0 %v589_v52 }
  0x34   :  { %511 = vmatmul.mubr.msk.f32.vlgmr.msra.gmra.mrb[4].mxu0 %vm111_vm0, %v31_v53 }
  0xf7   :  { %v440_v55 = vpop.f32.mrb[0].mxu0 }
  0xf8   :  { %v441_v57 = vpop.f32.mrb[1].mxu0 }
  0xf9   :  { %v478_v58 = vpop.f32.mrb[0].mxu1  ;;  %v442_v59 = vadd.f32 %v441_v57, %v440_v55 }
  0xfa   :  { %v479_v60 = vpop.f32.mrb[1].mxu1 }
  0xfb   :  { %v480_v61 = vadd.f32 %v479_v60, %v478_v58  ;;  %v185_v62 = vadd.f32 %v442_v59, %v399_v56  ;;  %v443_v63 = vpop.f32.mrb[2].mxu0 }
  0xfc   :  { %v444_v0 = vpop.f32.mrb[3].mxu0 }
  0xfd   :  { %v481_v1 = vpop.f32.mrb[2].mxu1  ;;  %v445_v2 = vadd.f32 %v444_v0, %v443_v63  ;;  %v260_v4 = vadd.f32 %v480_v61, %v185_v62 }
  0xfe   :  { %v482_v3 = vpop.f32.mrb[3].mxu1 }
  0xff   :  { %v483_v5 = vadd.f32 %v482_v3, %v481_v1  ;;  %v190_v6 = vadd.f32 %v445_v2, %v399_v56 }
 0x101   :  { %v265_v7 = vadd.f32 %v483_v5, %v190_v6 }
 0x107   :  { %v512_v8 = vpop.f32.mrb[4].mxu0 }
 0x108   :  { %v340_v9 = vadd.f32 %v512_v8, %v265_v7  ;;  %v334_v10 = vpop.f32.mrb[5].mxu0 }
 0x109   :  { %v335_v11 = vadd.f32 %v334_v10, %v260_v4 }
 0x10a   :  { %v403_v12 = vmul.f32 -1.442695, %v340_v9 }
 0x10b   :  { %v402_v13 = vmul.f32 -1.442695, %v335_v11 }
 0x10c   :  { %593 = vpow2.f32 %v403_v12 }
 0x10d   :  { %595 = vpow2.f32 %v402_v13 }
 0x116   :  { %v594_v14 = vpop.eup %593 }
 0x117   :  { %v596_v15 = vpop.eup %595  ;;  %v350_v16 = vadd.f32 1.0, %v594_v14 }
 0x118   :  { %v349_v17 = vadd.f32 1.0, %v596_v15 }
 0x119   :  { %597 = vrcp.f32 %v350_v16 }
 0x11a   :  { %599 = vrcp.f32 %v349_v17 }
 0x123   :  { %v598_v19 = vpop.eup %597 }
 0x124   :  { %v600_v20 = vpop.eup %599  ;;  %v363_v23 = vmul.f32 %v598_v19, %v404_v18 }
 0x125   :  { %v362_v21 = vmul.f32 %v600_v20, %v404_v18 }
 0x126   :  { %v368_v24 = vsel %vm364_vm1, %v363_v23, 0.0 }
 0x127   :  { %v365_v22 = vsel %vm364_vm1, %v362_v21, 0.0 }
 0x128   :  { %366 = vadd.xlane.f32.xlu0 %v365_v22 }
 0x12c   :  { %369 = vadd.xlane.f32.xlu0 %v368_v24 }
 0x1b5   :  { %v367_v26 = vpop.xlane.xlu0 %366 }
 0x1b6   :  { %v378_v27 = vadd.f32 %v405_v25, %v367_v26 }
 0x1b8   :  { %v406_v28 = vmul.f32 -1.442695, %v378_v27 }
 0x1b9   :  { %v370_v29 = vpop.xlane.xlu0 %369 }
 0x1ba   :  { %601 = vpow2.f32 %v406_v28  ;;  %v379_v30 = vadd.f32 %v405_v25, %v370_v29 }
 0x1bc   :  { %v407_v31 = vmul.f32 -1.442695, %v379_v30 }
 0x1be   :  { %603 = vpow2.f32 %v407_v31 }
 0x1c4   :  { %v602_v32 = vpop.eup %601 }
 0x1c5   :  { %v386_v33 = vadd.f32 1.0, %v602_v32 }
 0x1c7   :  { %605 = vrcp.f32 %v386_v33 }
 0x1c8   :  { %v604_v34 = vpop.eup %603 }
 0x1c9   :  { %v387_v35 = vadd.f32 1.0, %v604_v34 }
 0x1cb   :  { %607 = vrcp.f32 %v387_v35 }
 0x1d1   :  { %v606_v36 = vpop.eup %605 }
 0x1d2   :  { %393 = vst.msk [vmem:[%s905_s5] sm:$0xff] %vm392_vm2, %v606_v36 }
 0x1d5   :  { %v608_v37 = vpop.eup %607 }
 0x1d6   :  { %394 = vst.msk [vmem:[%s905_s5 + $0x8] sm:$0xff] %vm392_vm2, %v608_v37 }

</bundles_post_ra>
